<compile_context>
chip_gen: v6e
topology: v6e:2x2x1
jax: 0.10.0
libtpu: 0.0.40
codegen_flags: <defaults>
</compile_context>

<pallas_src>
import functools

import jax
import jax.numpy as jnp
from jax.experimental import pallas as pl
from jax.experimental.pallas import tpu as pltpu

_LANES = 128
_DEFAULT_BLOCK_BYTES = 2 * 1024 * 1024   # ~2 MiB per input per grid step
_SMALL_INPUT_BYTES = 2 * 1024 * 1024     # below this, fused XLA beats a kernel


def _detect_num_cores():
    """2 TensorCores per chip on v7x (and v4/v5p megacore); 1 on v5e/v6e."""
    try:
        kind = jax.devices()[0].device_kind.lower()
    except Exception:
        return 1
    if "v7" in kind or "v4" in kind or "v5p" in kind:
        # TODO(synk): verify in an xprof trace that the leading "parallel"
        # grid axis really shards across both TensorCores on v7x; if not,
        # switch the first dimension_semantics entry to pltpu.CORE_PARALLEL.
        return 2
    return 1


def _mse_fallback(x, y):
    d = x.astype(jnp.float32) - y.astype(jnp.float32)
    return jnp.mean(d * d)


def _mse_sum_kernel(x_ref, y_ref, o_ref, acc_ref, *, num_groups, group_tile,
                    blocks_per_core, has_partial):
    """Accumulates sum((x-y)^2) of one (group_tile, sublanes, 128) block into
    a vreg-resident f32 partial; writes the per-core partial on the last step."""
    c = pl.program_id(0)   # core split            ("parallel")
    i = pl.program_id(1)   # reduction over blocks ("arbitrary")

    @pl.when(i == 0)
    def _():
        acc_ref[...] = jnp.zeros_like(acc_ref)

    # Cast on the VPU (free vs. the memory bound); accumulate in f32.
    d = x_ref[...].astype(jnp.float32) - y_ref[...].astype(jnp.float32)
    sq = d * d                                    # (group_tile, sublanes, 128)

    if has_partial:
        first_group = (c * blocks_per_core + i) * group_tile
        is_full = first_group + group_tile <= num_groups

        # Steady state: unmasked pure-VPU fold of the block.
        @pl.when(is_full)
        def _():
            acc_ref[...] += jnp.sum(sq, axis=0)

        # Only the ragged last block (and fully-redundant clamped blocks when
        # the block count doesn't split evenly across cores) pay for the mask.
        @pl.when(jnp.logical_not(is_full))
        def _():
            valid = num_groups - first_group      # may be <= 0 (clamped block)
            grp = jax.lax.broadcasted_iota(jnp.int32, sq.shape, 0)
            acc_ref[...] += jnp.sum(jnp.where(grp < valid, sq, 0.0), axis=0)
    else:
        acc_ref[...] += jnp.sum(sq, axis=0)

    @pl.when(i == pl.num_programs(1) - 1)
    def _():
        o_ref[...] = acc_ref[...][None]           # (1, sublanes, 128) partial


def mse_loss_pallas(x, y, *, target_block_bytes=_DEFAULT_BLOCK_BYTES,
                    force_kernel=False):
    """Mean squared error over all elements (torch.nn.MSELoss default 'mean')."""
    assert x.shape == y.shape, "x and y must have the same shape"
    n = x.size

    # Native packed vreg height: f32 -> (8,128), bf16 -> (16,128), int8/fp8 -> (32,128).
    itemsize = max(x.dtype.itemsize, y.dtype.itemsize)
    sublanes = {1: 32, 2: 16}.get(itemsize, 8)
    group = sublanes * _LANES                     # elements per vreg group
    per_elem_bytes = x.dtype.itemsize + y.dtype.itemsize

    xf = x.reshape(-1)
    yf = y.reshape(-1)

    n_main = (n // group) * group
    if n_main == 0 or (not force_kernel and n * per_elem_bytes < _SMALL_INPUT_BYTES):
        # Tiny problem: pallas_call fixed overhead exceeds a fused XLA reduce.
        return _mse_fallback(xf, yf)

    # Group-aligned prefix views: contiguous leading slice + reshape (no pad copy).
    num_groups = n_main // group
    x3d = xf[:n_main].reshape(num_groups, sublanes, _LANES)
    y3d = yf[:n_main].reshape(num_groups, sublanes, _LANES)

    # Largest block near target_block_bytes per input (capped at the data size).
    per_group_bytes = sublanes * _LANES * itemsize
    group_tile = max(1, min(target_block_bytes // per_group_bytes, num_groups))
    num_blocks = pl.cdiv(num_groups, group_tile)
    num_cores = _detect_num_cores()
    blocks_per_core = pl.cdiv(num_blocks, num_cores)
    has_partial = (num_groups % group_tile != 0) or (
        num_cores * blocks_per_core != num_blocks)

    def in_index_map(c, i):
        # Clamp so redundant blocks (odd block counts across cores) re-read a
        # valid block; the in-kernel mask zeroes their contribution.
        return (jnp.minimum(c * blocks_per_core + i, num_blocks - 1), 0, 0)

    kernel = functools.partial(
        _mse_sum_kernel,
        num_groups=num_groups,
        group_tile=group_tile,
        blocks_per_core=blocks_per_core,
        has_partial=has_partial,
    )

    # Size VMEM to actual use (2 inputs x 2 pipeline buffers x block, plus the
    # double-buffered output tile and the accumulator) with ~2x headroom; never
    # request 64 MiB (v7x only has 64 MiB per TensorCore).
    vreg_bytes = sublanes * _LANES * 4
    block_in_bytes = group_tile * sublanes * _LANES * per_elem_bytes
    vmem_needed = 2 * block_in_bytes + 3 * vreg_bytes
    vmem_limit = int(min(max(2 * vmem_needed + (1 << 20), 8 << 20), 32 << 20))

    cost = pl.CostEstimate(
        flops=3 * n_main,
        transcendentals=0,
        bytes_accessed=n_main * per_elem_bytes + num_cores * vreg_bytes,
    )

    partials = pl.pallas_call(
        kernel,
        out_shape=jax.ShapeDtypeStruct((num_cores, sublanes, _LANES),
                                       jnp.float32),
        grid_spec=pltpu.PrefetchScalarGridSpec(
            num_scalar_prefetch=0,
            grid=(num_cores, blocks_per_core),
            in_specs=[
                pl.BlockSpec((group_tile, sublanes, _LANES), in_index_map),
                pl.BlockSpec((group_tile, sublanes, _LANES), in_index_map),
            ],
            out_specs=pl.BlockSpec((1, sublanes, _LANES),
                                   lambda c, i: (c, 0, 0)),
            scratch_shapes=[pltpu.VMEM((sublanes, _LANES), jnp.float32)],
        ),
        compiler_params=pltpu.CompilerParams(
            dimension_semantics=("parallel", "arbitrary"),
            vmem_limit_bytes=vmem_limit,
        ),
        cost_estimate=cost,
    )(x3d, y3d)

    # One tiny cross-lane reduction of the per-core partials.
    # TODO(synk): for n >~ 1e9 a two-level (pairwise) f32 accumulation would
    # tighten the summation error; torch-MSELoss-level accuracy is met as-is.
    total = jnp.sum(partials, dtype=jnp.float32)

    # Ragged tail (< one vreg group): plain-JAX sum, no pad copy of the inputs.
    tail = n - n_main
    if tail:
        dt = xf[n_main:].astype(jnp.float32) - yf[n_main:].astype(jnp.float32)
        total = total + jnp.sum(dt * dt)

    return total / jnp.float32(n)


def weight_decay_loss_forward(x, y, net=None):
    """Equivalent of Weight_Decay_Loss(nn.MSELoss()).forward(x, y, net)."""
    # `net` is accepted but ignored, exactly like the PyTorch module's forward.
    return mse_loss_pallas(x, y)


if __name__ == "__main__":
    key = jax.random.PRNGKey(0)
    kx, ky = jax.random.split(key)
    # Small NCHW shapes consistent with an image-reconstruction loss.
    x = jax.random.normal(kx, (2, 4, 16, 16), dtype=jnp.float32)
    y = jax.random.normal(ky, (2, 4, 16, 16), dtype=jnp.float32)
    ref = jnp.mean((x - y) ** 2)

    # Module-equivalent call (tiny input -> takes the fused-XLA fallback path).
    loss = jax.block_until_ready(weight_decay_loss_forward(x, y, net=None))
    assert jnp.allclose(loss, ref, rtol=1e-5, atol=1e-6), (loss, ref)

    # Force the Pallas kernel path (1024-aligned element count).
    loss_k = jax.block_until_ready(mse_loss_pallas(x, y, force_kernel=True))
    assert jnp.allclose(loss_k, ref, rtol=1e-5, atol=1e-6), (loss_k, ref)

    # Ragged-tail case: kernel on the aligned prefix + plain-JAX tail.
    xr = jax.random.normal(kx, (2, 4, 16, 17), dtype=jnp.float32)
    yr = jax.random.normal(ky, (2, 4, 16, 17), dtype=jnp.float32)
    loss_r = jax.block_until_ready(mse_loss_pallas(xr, yr, force_kernel=True))
    ref_r = jnp.mean((xr - yr) ** 2)
    assert jnp.allclose(loss_r, ref_r, rtol=1e-5, atol=1e-6), (loss_r, ref_r)

    # bf16 inputs exercise the packed (G, 16, 128) layout.
    xb = x.astype(jnp.bfloat16)
    yb = y.astype(jnp.bfloat16)
    loss_b = jax.block_until_ready(mse_loss_pallas(xb, yb, force_kernel=True))
    ref_b = jnp.mean((xb.astype(jnp.float32) - yb.astype(jnp.float32)) ** 2)
    assert jnp.allclose(loss_b, ref_b, rtol=1e-4, atol=1e-5), (loss_b, ref_b)

    print("KERNEL_OK")
</pallas_src>

<mosaic_0001>
module attributes {stable_mosaic.version = 11 : i64} {
  func.func @_mse_sum_kernel(%arg0: i32, %arg1: i32, %arg2: memref<2x8x128xf32, #tpu.memory_space<vmem>>, %arg3: memref<2x8x128xf32, #tpu.memory_space<vmem>>, %arg4: memref<1x8x128xf32, #tpu.memory_space<vmem>>, %arg5: memref<8x128xf32, #tpu.memory_space<vmem>>) attributes {dimension_semantics = [#tpu.dimension_semantics<parallel>, #tpu.dimension_semantics<arbitrary>], iteration_bounds = array<i64: 1, 1>, scalar_prefetch = 0 : i64, scratch_operands = 1 : i64, tpu.core_type = #tpu.core_type<tc>, window_params = [{transform_indices = @transform_0, window_bounds = array<i64: 2, 8, 128>}, {transform_indices = @transform_1, window_bounds = array<i64: 2, 8, 128>}, {transform_indices = @transform_2, window_bounds = array<i64: 1, 8, 128>}]} {
    %c0_i32 = arith.constant 0 : i32
    %0 = arith.cmpi eq, %arg1, %c0_i32 : i32
    %1 = arith.extui %0 : i1 to i32
    %c0_i32_0 = arith.constant 0 : i32
    %2 = arith.cmpi ne, %1, %c0_i32_0 : i32
    scf.if %2 {
      %cst_12 = arith.constant 0.000000e+00 : f32
      %14 = vector.broadcast %cst_12 : f32 to vector<8x128xf32>
      %c0_13 = arith.constant 0 : index
      %c0_14 = arith.constant 0 : index
      %15 = vector.load %arg5[%c0_13, %c0_14] : memref<8x128xf32, #tpu.memory_space<vmem>>, vector<8x128xf32>
      tpu.vector_store %arg5[%c0_13, %c0_14], %14 {strides = array<i32>} : memref<8x128xf32, #tpu.memory_space<vmem>>, vector<8x128xf32>,
    } else {
    }
    %c0 = arith.constant 0 : index
    %c0_1 = arith.constant 0 : index
    %c0_2 = arith.constant 0 : index
    %3 = vector.load %arg2[%c0, %c0_1, %c0_2] : memref<2x8x128xf32, #tpu.memory_space<vmem>>, vector<2x8x128xf32>
    %c0_3 = arith.constant 0 : index
    %c0_4 = arith.constant 0 : index
    %c0_5 = arith.constant 0 : index
    %4 = vector.load %arg3[%c0_3, %c0_4, %c0_5] : memref<2x8x128xf32, #tpu.memory_space<vmem>>, vector<2x8x128xf32>
    %5 = arith.subf %3, %4 : vector<2x8x128xf32>
    %6 = arith.mulf %5, %5 : vector<2x8x128xf32>
    %c0_6 = arith.constant 0 : index
    %c0_7 = arith.constant 0 : index
    %7 = vector.load %arg5[%c0_6, %c0_7] : memref<8x128xf32, #tpu.memory_space<vmem>>, vector<8x128xf32>
    %cst = arith.constant dense<0.000000e+00> : vector<8x128xf32>
    %8 = vector.multi_reduction <add>, %6, %cst [0] : vector<2x8x128xf32> to vector<8x128xf32>
    %9 = arith.addf %7, %8 : vector<8x128xf32>
    %c0_8 = arith.constant 0 : index
    %c0_9 = arith.constant 0 : index
    %10 = vector.load %arg5[%c0_8, %c0_9] : memref<8x128xf32, #tpu.memory_space<vmem>>, vector<8x128xf32>
    tpu.vector_store %arg5[%c0_8, %c0_9], %9 {strides = array<i32>} : memref<8x128xf32, #tpu.memory_space<vmem>>, vector<8x128xf32>,
    %c0_i32_10 = arith.constant 0 : i32
    %11 = arith.cmpi eq, %arg1, %c0_i32_10 : i32
    %12 = arith.extui %11 : i1 to i32
    %c0_i32_11 = arith.constant 0 : i32
    %13 = arith.cmpi ne, %12, %c0_i32_11 : i32
    scf.if %13 {
      %c0_12 = arith.constant 0 : index
      %c0_13 = arith.constant 0 : index
      %14 = vector.load %arg5[%c0_12, %c0_13] : memref<8x128xf32, #tpu.memory_space<vmem>>, vector<8x128xf32>
      %15 = vector.shape_cast %14 : vector<8x128xf32> to vector<1x8x128xf32>
      %c0_14 = arith.constant 0 : index
      %c0_15 = arith.constant 0 : index
      %c0_16 = arith.constant 0 : index
      %16 = vector.load %arg4[%c0_14, %c0_15, %c0_16] : memref<1x8x128xf32, #tpu.memory_space<vmem>>, vector<1x8x128xf32>
      tpu.vector_store %arg4[%c0_14, %c0_15, %c0_16], %15 {strides = array<i32>} : memref<1x8x128xf32, #tpu.memory_space<vmem>>, vector<1x8x128xf32>,
    } else {
    }
    return
  }
  func.func @transform_0(%arg0: i32, %arg1: i32) -> (i32, i32, i32) {
    %c1_i32 = arith.constant 1 : i32
    %0 = arith.muli %arg0, %c1_i32 : i32
    %1 = arith.addi %0, %arg1 : i32
    %c0_i32 = arith.constant 0 : i32
    %2 = arith.minsi %1, %c0_i32 : i32
    %c0_i32_0 = arith.constant 0 : i32
    %c0_i32_1 = arith.constant 0 : i32
    %c0_i32_2 = arith.constant 0 : i32
    return %2, %c0_i32_0, %c0_i32_1 : i32, i32, i32
  }
  func.func @transform_1(%arg0: i32, %arg1: i32) -> (i32, i32, i32) {
    %c1_i32 = arith.constant 1 : i32
    %0 = arith.muli %arg0, %c1_i32 : i32
    %1 = arith.addi %0, %arg1 : i32
    %c0_i32 = arith.constant 0 : i32
    %2 = arith.minsi %1, %c0_i32 : i32
    %c0_i32_0 = arith.constant 0 : i32
    %c0_i32_1 = arith.constant 0 : i32
    %c0_i32_2 = arith.constant 0 : i32
    return %2, %c0_i32_0, %c0_i32_1 : i32, i32, i32
  }
  func.func @transform_2(%arg0: i32, %arg1: i32) -> (i32, i32, i32) {
    %c0_i32 = arith.constant 0 : i32
    %c0_i32_0 = arith.constant 0 : i32
    %c0_i32_1 = arith.constant 0 : i32
    return %arg0, %c0_i32, %c0_i32_0 : i32, i32, i32
  }
}

</mosaic_0001>

<bundles_post_ra>
// kernel: tpu_custom_call.1
= control target key start
LH: loop header
LB: loop body
LE: loop exit
PB: predicated region body
PF: predicated region fallthrough
CT: control target
= control target key end

     0   :  { %7 = vsyncpa [#allocation4], 0  ;;  %s202_s0 = inlined_call_operand.hbm [shape: f32[2,8,128], index: 0, kind: input, shape index: {}]   ;;  %s203_s1 = inlined_call_operand.hbm [shape: f32[2,8,128], index: 1, kind: input, shape index: {}]   ;;  %s204_s2 = inlined_call_operand.hbm [shape: f32[1,8,128], index: 2, kind: output, shape index: {}]  }
   0x1   :  { %8 = vsyncpa [#allocation7], 0 }
   0x2   :  { %9 = vsyncpa [#allocation5], 0  ;;  %s173_s9 = smov [#allocation3]  }
   0x3   :  { %s21_s10 = sshll.u32 %s173_s9, 4  ;;  %s22_s10 = int_to_ptr.vmem [resolvable:$true] %s21_s10 }
   0x4   :  { %s115_s11 = scalar_lea.vmem %s22_s10, 256  ;;  %p120_p1 = scmp.lt.s32.totalorder %s22_s10, %s22_s10 }
   0x5   :  { %p116_p0 = scmp.ne.s32.totalorder %s22_s10, %s115_s11  ;;  %p121_p2 = scmp.lt.s32.totalorder %s115_s11, %s115_s11 }
   0x7   :  { %p122_p3 = por %p121_p2, %p120_p1 }
   0x9   :  { %p123_p4 = pnand %p122_p3, %p116_p0 }
   0xb   :  { %126 = shalt.err (!%p123_p4)
}
   0xc   :  { %s174_s12 = smov 128   ;;  %s175_s13 = smov 8  }
   0xd   :  { %27 = dma.hbm_to_vmem [thread:$0]  %s202_s0, 256, %s22_s10, [#allocation4], %s174_s12, %s174_s12, %s175_s13  }
   0xe   :  { %s176_s16 = smov [#allocation6]  }
   0xf   :  { %s39_s17 = sshll.u32 %s176_s16, 4  ;;  %s40_s17 = int_to_ptr.vmem [resolvable:$true] %s39_s17 }
  0x10   :  { %s135_s18 = scalar_lea.vmem %s40_s17, 256  ;;  %p140_p6 = scmp.lt.s32.totalorder %s40_s17, %s40_s17 }
  0x11   :  { %p136_p5 = scmp.ne.s32.totalorder %s40_s17, %s135_s18  ;;  %p141_p7 = scmp.lt.s32.totalorder %s135_s18, %s135_s18 }
  0x13   :  { %p142_p8 = por %p141_p7, %p140_p6 }
  0x15   :  { %p143_p9 = pnand %p142_p8, %p136_p5 }
  0x17   :  { %146 = shalt.err (!%p143_p9)
}
  0x18   :  { %45 = dma.hbm_to_vmem [thread:$0]  %s203_s1, 256, %s40_s17, [#allocation7], %s174_s12, %s174_s12, %s175_s13  }
  0x19   :  { %167 = dma.done.wait [#allocation4], 256  }
  0x1a   :  { %168 = vsyncadd [#allocation4], 4294967040 }
  0x1b   :  { %169 = dma.done.wait [#allocation7], 256  }
  0x1c   :  { %170 = vsyncadd [#allocation7], 4294967040  ;;  %v65_v0 = vld [vmem:[#allocation3] sm:$0xff]  ;;  %v66_v1 = vld [vmem:[#allocation3 + $0x8] sm:$0xff]  ;;  %s177_s0 = smov [#allocation8]  }
  0x1d   :  { %v67_v2 = vld [vmem:[#allocation6] sm:$0xff]  ;;  %v68_v3 = vld [vmem:[#allocation6 + $0x8] sm:$0xff]  ;;  %s88_s21 = sshll.u32 %s177_s0, 4  ;;  %s89_s21 = int_to_ptr.vmem [resolvable:$true] %s88_s21 }
  0x1e   :  { %v69_v4 = vsub.f32 %v65_v0, %v67_v2  ;;  %v70_v5 = vsub.f32 %v66_v1, %v68_v3  ;;  %s147_s22 = scalar_lea.vmem %s89_s21, 128  ;;  %p152_p11 = scmp.lt.s32.totalorder %s89_s21, %s89_s21 }
  0x1f   :  { %p148_p10 = scmp.ne.s32.totalorder %s89_s21, %s147_s22  ;;  %p153_p12 = scmp.lt.s32.totalorder %s147_s22, %s147_s22 }
  0x20   :  { %v71_v6 = vmul.f32 %v69_v4, %v69_v4  ;;  %v72_v7 = vmul.f32 %v70_v5, %v70_v5 }
  0x21   :  { %p154_p13 = por %p153_p12, %p152_p11 }
  0x22   :  { %v74_v8 = vadd.f32 %v72_v7, %v71_v6 }
  0x23   :  { %p155_p0 = pnand %p154_p13, %p148_p10 }
  0x24   :  { %81 = vst [vmem:[#allocation8] sm:$0xff] %v74_v8 }
  0x25   :  { %158 = shalt.err (!%p155_p0)
}
  0x26   :  { %91 = dma.vmem_to_hbm [thread:$0]  %s89_s21, 128, %s204_s2, [#allocation5]  }
  0x27   :  { %171 = dma.done.wait [#allocation5], 128  }
  0x28   :  { %172 = vsyncadd [#allocation5], 4294967168 }
  0x29   :  { %95 = vsyncpa [#allocation4], 1 }
  0x2a   :  { %96 = vsyncpa [#allocation7], 1 }
  0x2b   :  { %97 = vsyncpa [#allocation5], 1 }

</bundles_post_ra>
